<compile_context>
chip_gen: v7x
topology: tpu7x:2x2x1
jax: 0.10.0
libtpu: 0.0.40
codegen_flags: <defaults>
</compile_context>

<pallas_src>
import jax
import jax.numpy as jnp
from jax.experimental import pallas as pl
from jax.experimental.pallas import tpu as pltpu

NeuronCount = [2, 5, 1]
TILE_N = 1024  # batch lanes per grid step (multiple of 128)


def pinn_kernel(x_ref, w1_ref, b1_ref, w2_ref, b2_ref, o_ref):
    # x_ref: (2, TILE_N) in VMEM, batch on the lane axis.
    # w*/b*: tiny SMEM-resident parameter tables (21 scalars total).
    x0 = x_ref[0:1, :]  # (1, TILE_N)
    x1 = x_ref[1:2, :]  # (1, TILE_N)
    y = jnp.full_like(x0, b2_ref[0, 0])
    # Hidden width is 5 -> fully unrolled VPU FMAs + EUP tanh (no MXU).
    for j in range(NeuronCount[1]):
        h_j = jnp.tanh(w1_ref[0, j] * x0 + w1_ref[1, j] * x1 + b1_ref[0, j])
        y = y + w2_ref[j, 0] * h_j
    o_ref[...] = y.astype(o_ref.dtype)


def pinn_forward(x, w1, b1, w2, b2, *, tile_n=TILE_N):
    """x: (N, 2) f32 -> (N, 1) f32. Matches PyTorch Linear(2,5)-tanh-Linear(5,1).

    Weights are stored pre-transposed as (in_features, out_features), so the
    math is y = tanh(x @ w1 + b1) @ w2 + b2 (same as nn.Linear with W.T).
    """
    n = x.shape[0]
    n_pad = tile_n * pl.cdiv(n, tile_n)
    # Batch on the lane (last) axis: (N, 2) -> (2, N_pad). Padding is zeros
    # (finite through tanh) and is sliced off after the kernel.
    x_t = jnp.zeros((NeuronCount[0], n_pad), jnp.float32).at[:, :n].set(x.T)

    smem = pl.BlockSpec(memory_space=pltpu.MemorySpace.SMEM)
    out = pl.pallas_call(
        pinn_kernel,
        out_shape=jax.ShapeDtypeStruct((1, n_pad), jnp.float32),
        grid=(n_pad // tile_n,),
        in_specs=[
            pl.BlockSpec((NeuronCount[0], tile_n), lambda i: (0, i)),
            smem,  # w1 (2, 5)
            smem,  # b1 (1, 5)
            smem,  # w2 (5, 1)
            smem,  # b2 (1, 1)
        ],
        out_specs=pl.BlockSpec((1, tile_n), lambda i: (0, i)),
        compiler_params=pltpu.CompilerParams(
            dimension_semantics=("parallel",),
        ),
    )(x_t, w1, b1, w2, b2)
    return out[0, :n].reshape(n, 1)


def init_params(key, neuron_count):
    """Deterministic init mimicking nn.Linear's U(-1/sqrt(fan_in), 1/sqrt(fan_in))."""
    params = []
    for i in range(len(neuron_count) - 1):
        fan_in, fan_out = neuron_count[i], neuron_count[i + 1]
        key, kw, kb = jax.random.split(key, 3)
        bound = 1.0 / jnp.sqrt(float(fan_in))
        w = jax.random.uniform(kw, (fan_in, fan_out), jnp.float32, -bound, bound)
        b = jax.random.uniform(kb, (1, fan_out), jnp.float32, -bound, bound)
        params.append((w, b))
    return params


def reference_forward(x, params):
    h = x
    for (w, b) in params[:-1]:
        h = jnp.tanh(h @ w + b)
    w, b = params[-1]
    return h @ w + b


if __name__ == "__main__":
    key = jax.random.PRNGKey(0)
    key, kx = jax.random.split(key)

    batch = 2000  # non-multiple of TILE_N to exercise padding + multi-step grid
    x = jax.random.normal(kx, (batch, NeuronCount[0]), dtype=jnp.float32)

    (w1, b1), (w2, b2) = init_params(key, NeuronCount)

    out = jax.block_until_ready(pinn_forward(x, w1, b1, w2, b2))
    ref = reference_forward(x, [(w1, b1), (w2, b2)])

    assert out.shape == (batch, NeuronCount[-1]), out.shape
    assert jnp.allclose(out, ref, atol=1e-5, rtol=1e-5), (
        float(jnp.max(jnp.abs(out - ref))),
    )

    print("KERNEL_OK")
</pallas_src>

<mosaic_0001>
module attributes {stable_mosaic.version = 11 : i64} {
  func.func @pinn_kernel(%arg0: i32, %arg1: memref<2x1024xf32, #tpu.memory_space<vmem>>, %arg2: memref<2x5xf32, #tpu.memory_space<smem>>, %arg3: memref<1x5xf32, #tpu.memory_space<smem>>, %arg4: memref<5x1xf32, #tpu.memory_space<smem>>, %arg5: memref<1x1xf32, #tpu.memory_space<smem>>, %arg6: memref<1x1024xf32, #tpu.memory_space<vmem>>) attributes {dimension_semantics = [#tpu.dimension_semantics<parallel>], iteration_bounds = array<i64: 2>, scalar_prefetch = 0 : i64, scratch_operands = 0 : i64, tpu.core_type = #tpu.core_type<tc>, window_params = [{transform_indices = @transform_0, window_bounds = array<i64: 2, 1024>}, {transform_indices = @transform_1, window_bounds = array<i64: 2, 5>}, {transform_indices = @transform_2, window_bounds = array<i64: 1, 5>}, {transform_indices = @transform_3, window_bounds = array<i64: 5, 1>}, {transform_indices = @transform_4, window_bounds = array<i64: 1, 1>}, {transform_indices = @transform_5, window_bounds = array<i64: 1, 1024>}]} {
    %c0 = arith.constant 0 : index
    %c0_0 = arith.constant 0 : index
    %0 = vector.load %arg1[%c0, %c0_0] : memref<2x1024xf32, #tpu.memory_space<vmem>>, vector<1x1024xf32>
    %c1 = arith.constant 1 : index
    %c0_1 = arith.constant 0 : index
    %1 = vector.load %arg1[%c1, %c0_1] : memref<2x1024xf32, #tpu.memory_space<vmem>>, vector<1x1024xf32>
    %c0_2 = arith.constant 0 : index
    %c0_3 = arith.constant 0 : index
    %2 = memref.load %arg5[%c0_2, %c0_3] : memref<1x1xf32, #tpu.memory_space<smem>>
    %3 = vector.broadcast %2 : f32 to vector<1x1024xf32>
    %c0_4 = arith.constant 0 : index
    %c0_5 = arith.constant 0 : index
    %4 = memref.load %arg2[%c0_4, %c0_5] : memref<2x5xf32, #tpu.memory_space<smem>>
    %5 = vector.broadcast %4 : f32 to vector<1x1024xf32>
    %6 = arith.mulf %5, %0 : vector<1x1024xf32>
    %c1_6 = arith.constant 1 : index
    %c0_7 = arith.constant 0 : index
    %7 = memref.load %arg2[%c1_6, %c0_7] : memref<2x5xf32, #tpu.memory_space<smem>>
    %8 = vector.broadcast %7 : f32 to vector<1x1024xf32>
    %9 = arith.mulf %8, %1 : vector<1x1024xf32>
    %10 = arith.addf %6, %9 : vector<1x1024xf32>
    %c0_8 = arith.constant 0 : index
    %c0_9 = arith.constant 0 : index
    %11 = memref.load %arg3[%c0_8, %c0_9] : memref<1x5xf32, #tpu.memory_space<smem>>
    %12 = vector.broadcast %11 : f32 to vector<1x1024xf32>
    %13 = arith.addf %10, %12 : vector<1x1024xf32>
    %14 = math.tanh %13 : vector<1x1024xf32>
    %c0_10 = arith.constant 0 : index
    %c0_11 = arith.constant 0 : index
    %15 = memref.load %arg4[%c0_10, %c0_11] : memref<5x1xf32, #tpu.memory_space<smem>>
    %16 = vector.broadcast %15 : f32 to vector<1x1024xf32>
    %17 = arith.mulf %16, %14 : vector<1x1024xf32>
    %18 = arith.addf %3, %17 : vector<1x1024xf32>
    %c0_12 = arith.constant 0 : index
    %c1_13 = arith.constant 1 : index
    %19 = memref.load %arg2[%c0_12, %c1_13] : memref<2x5xf32, #tpu.memory_space<smem>>
    %20 = vector.broadcast %19 : f32 to vector<1x1024xf32>
    %21 = arith.mulf %20, %0 : vector<1x1024xf32>
    %c1_14 = arith.constant 1 : index
    %c1_15 = arith.constant 1 : index
    %22 = memref.load %arg2[%c1_14, %c1_15] : memref<2x5xf32, #tpu.memory_space<smem>>
    %23 = vector.broadcast %22 : f32 to vector<1x1024xf32>
    %24 = arith.mulf %23, %1 : vector<1x1024xf32>
    %25 = arith.addf %21, %24 : vector<1x1024xf32>
    %c0_16 = arith.constant 0 : index
    %c1_17 = arith.constant 1 : index
    %26 = memref.load %arg3[%c0_16, %c1_17] : memref<1x5xf32, #tpu.memory_space<smem>>
    %27 = vector.broadcast %26 : f32 to vector<1x1024xf32>
    %28 = arith.addf %25, %27 : vector<1x1024xf32>
    %29 = math.tanh %28 : vector<1x1024xf32>
    %c1_18 = arith.constant 1 : index
    %c0_19 = arith.constant 0 : index
    %30 = memref.load %arg4[%c1_18, %c0_19] : memref<5x1xf32, #tpu.memory_space<smem>>
    %31 = vector.broadcast %30 : f32 to vector<1x1024xf32>
    %32 = arith.mulf %31, %29 : vector<1x1024xf32>
    %33 = arith.addf %18, %32 : vector<1x1024xf32>
    %c0_20 = arith.constant 0 : index
    %c2 = arith.constant 2 : index
    %34 = memref.load %arg2[%c0_20, %c2] : memref<2x5xf32, #tpu.memory_space<smem>>
    %35 = vector.broadcast %34 : f32 to vector<1x1024xf32>
    %36 = arith.mulf %35, %0 : vector<1x1024xf32>
    %c1_21 = arith.constant 1 : index
    %c2_22 = arith.constant 2 : index
    %37 = memref.load %arg2[%c1_21, %c2_22] : memref<2x5xf32, #tpu.memory_space<smem>>
    %38 = vector.broadcast %37 : f32 to vector<1x1024xf32>
    %39 = arith.mulf %38, %1 : vector<1x1024xf32>
    %40 = arith.addf %36, %39 : vector<1x1024xf32>
    %c0_23 = arith.constant 0 : index
    %c2_24 = arith.constant 2 : index
    %41 = memref.load %arg3[%c0_23, %c2_24] : memref<1x5xf32, #tpu.memory_space<smem>>
    %42 = vector.broadcast %41 : f32 to vector<1x1024xf32>
    %43 = arith.addf %40, %42 : vector<1x1024xf32>
    %44 = math.tanh %43 : vector<1x1024xf32>
    %c2_25 = arith.constant 2 : index
    %c0_26 = arith.constant 0 : index
    %45 = memref.load %arg4[%c2_25, %c0_26] : memref<5x1xf32, #tpu.memory_space<smem>>
    %46 = vector.broadcast %45 : f32 to vector<1x1024xf32>
    %47 = arith.mulf %46, %44 : vector<1x1024xf32>
    %48 = arith.addf %33, %47 : vector<1x1024xf32>
    %c0_27 = arith.constant 0 : index
    %c3 = arith.constant 3 : index
    %49 = memref.load %arg2[%c0_27, %c3] : memref<2x5xf32, #tpu.memory_space<smem>>
    %50 = vector.broadcast %49 : f32 to vector<1x1024xf32>
    %51 = arith.mulf %50, %0 : vector<1x1024xf32>
    %c1_28 = arith.constant 1 : index
    %c3_29 = arith.constant 3 : index
    %52 = memref.load %arg2[%c1_28, %c3_29] : memref<2x5xf32, #tpu.memory_space<smem>>
    %53 = vector.broadcast %52 : f32 to vector<1x1024xf32>
    %54 = arith.mulf %53, %1 : vector<1x1024xf32>
    %55 = arith.addf %51, %54 : vector<1x1024xf32>
    %c0_30 = arith.constant 0 : index
    %c3_31 = arith.constant 3 : index
    %56 = memref.load %arg3[%c0_30, %c3_31] : memref<1x5xf32, #tpu.memory_space<smem>>
    %57 = vector.broadcast %56 : f32 to vector<1x1024xf32>
    %58 = arith.addf %55, %57 : vector<1x1024xf32>
    %59 = math.tanh %58 : vector<1x1024xf32>
    %c3_32 = arith.constant 3 : index
    %c0_33 = arith.constant 0 : index
    %60 = memref.load %arg4[%c3_32, %c0_33] : memref<5x1xf32, #tpu.memory_space<smem>>
    %61 = vector.broadcast %60 : f32 to vector<1x1024xf32>
    %62 = arith.mulf %61, %59 : vector<1x1024xf32>
    %63 = arith.addf %48, %62 : vector<1x1024xf32>
    %c0_34 = arith.constant 0 : index
    %c4 = arith.constant 4 : index
    %64 = memref.load %arg2[%c0_34, %c4] : memref<2x5xf32, #tpu.memory_space<smem>>
    %65 = vector.broadcast %64 : f32 to vector<1x1024xf32>
    %66 = arith.mulf %65, %0 : vector<1x1024xf32>
    %c1_35 = arith.constant 1 : index
    %c4_36 = arith.constant 4 : index
    %67 = memref.load %arg2[%c1_35, %c4_36] : memref<2x5xf32, #tpu.memory_space<smem>>
    %68 = vector.broadcast %67 : f32 to vector<1x1024xf32>
    %69 = arith.mulf %68, %1 : vector<1x1024xf32>
    %70 = arith.addf %66, %69 : vector<1x1024xf32>
    %c0_37 = arith.constant 0 : index
    %c4_38 = arith.constant 4 : index
    %71 = memref.load %arg3[%c0_37, %c4_38] : memref<1x5xf32, #tpu.memory_space<smem>>
    %72 = vector.broadcast %71 : f32 to vector<1x1024xf32>
    %73 = arith.addf %70, %72 : vector<1x1024xf32>
    %74 = math.tanh %73 : vector<1x1024xf32>
    %c4_39 = arith.constant 4 : index
    %c0_40 = arith.constant 0 : index
    %75 = memref.load %arg4[%c4_39, %c0_40] : memref<5x1xf32, #tpu.memory_space<smem>>
    %76 = vector.broadcast %75 : f32 to vector<1x1024xf32>
    %77 = arith.mulf %76, %74 : vector<1x1024xf32>
    %78 = arith.addf %63, %77 : vector<1x1024xf32>
    %c0_41 = arith.constant 0 : index
    %c0_42 = arith.constant 0 : index
    %79 = vector.load %arg6[%c0_41, %c0_42] : memref<1x1024xf32, #tpu.memory_space<vmem>>, vector<1x1024xf32>
    tpu.vector_store %arg6[%c0_41, %c0_42], %78 {strides = array<i32>} : memref<1x1024xf32, #tpu.memory_space<vmem>>, vector<1x1024xf32>,
    return
  }
  func.func @transform_0(%arg0: i32) -> (i32, i32) {
    %c0_i32 = arith.constant 0 : i32
    %c0_i32_0 = arith.constant 0 : i32
    return %c0_i32, %arg0 : i32, i32
  }
  func.func @transform_1(%arg0: i32) -> (i32, i32) {
    %c0_i32 = arith.constant 0 : i32
    %c0_i32_0 = arith.constant 0 : i32
    %c0_i32_1 = arith.constant 0 : i32
    return %c0_i32, %c0_i32_0 : i32, i32
  }
  func.func @transform_2(%arg0: i32) -> (i32, i32) {
    %c0_i32 = arith.constant 0 : i32
    %c0_i32_0 = arith.constant 0 : i32
    %c0_i32_1 = arith.constant 0 : i32
    return %c0_i32, %c0_i32_0 : i32, i32
  }
  func.func @transform_3(%arg0: i32) -> (i32, i32) {
    %c0_i32 = arith.constant 0 : i32
    %c0_i32_0 = arith.constant 0 : i32
    %c0_i32_1 = arith.constant 0 : i32
    return %c0_i32, %c0_i32_0 : i32, i32
  }
  func.func @transform_4(%arg0: i32) -> (i32, i32) {
    %c0_i32 = arith.constant 0 : i32
    %c0_i32_0 = arith.constant 0 : i32
    %c0_i32_1 = arith.constant 0 : i32
    return %c0_i32, %c0_i32_0 : i32, i32
  }
  func.func @transform_5(%arg0: i32) -> (i32, i32) {
    %c0_i32 = arith.constant 0 : i32
    %c0_i32_0 = arith.constant 0 : i32
    return %c0_i32, %arg0 : i32, i32
  }
}

</mosaic_0001>

<bundles_post_ra>
// kernel: tpu_custom_call.1
= control target key start
LH: loop header
LB: loop body
LE: loop exit
PB: predicated region body
PF: predicated region fallthrough
CT: control target
= control target key end

     0   :  { %s1019_s0 = inlined_call_operand.hbm [shape: f32[2,2048], index: 0, kind: input, shape index: {}]   ;;  %s1020_s1 = inlined_call_operand.vmem [shape: f32[2,5], index: 1, kind: input, shape index: {}]   ;;  %s1021_s2 = inlined_call_operand.vmem [shape: f32[1,5], index: 2, kind: input, shape index: {}]   ;;  %s1022_s3 = inlined_call_operand.vmem [shape: f32[5,1], index: 3, kind: input, shape index: {}]   ;;  %s1023_s4 = inlined_call_operand.<no memory space> [shape: f32[1,1], index: 4, kind: input, shape index: {}]   ;;  %s1024_s5 = inlined_call_operand.hbm [shape: f32[1,2048], index: 5, kind: output, shape index: {}]  }
   0x1   :  { %10 = sst [smem:[#allocation2]] %s1023_s4 }
   0x2   :  { %11 = vsyncpa [#allocation4], 0 }
   0x3   :  { %13 = vsyncpa [#allocation4 + $0x1], 0 }
   0x4   :  { %14 = vsyncpa [#allocation6], 0 }
   0x5   :  { %15 = vsyncpa [#allocation9], 0 }
   0x6   :  { %16 = vsyncpa [#allocation5], 0 }
   0x7   :  { %18 = vsyncpa [#allocation5 + $0x1], 0  ;;  %s796_s20 = smov 0   ;;  %s798_s21 = smov 0  }
   0x8   :  { %s800_s22 = smov 0   ;;  %s802_s23 = smov 0  }
   0x9 LB: > { %s817_s4 = sadd.s32 4294967295, %s756_s23   ;;  %s480_s24 = sadd.s32 4294967294, %s756_s23   ;;  %s756_s23 = sphi %s802_s23, %s1046_s23   ;;  %s752_s22 = sphi %s800_s22, %s1045_s22   ;;  %s748_s21 = sphi %s798_s21, %s1044_s21   ;;  %s744_s20 = sphi %s796_s20, %s1043_s20  }
   0xa   : > { %p44_p0 = scmp.ne.s32.totalorder %s748_s21, %s744_s20  ;;  %p1025_p1 = scmp.eq.s32.totalorder %s817_s4, 0 }
   0xb   : > { %p158_p3 = scmp.eq.s32.totalorder %s480_s24, 1  ;;  %p481_p5 = scmp.ge.s32.totalorder %s756_s23, 1 }
   0xc   : > { %p826_p4 = por %p1025_p1, %p44_p0  ;;  %p165_p7 = scmp.lt.s32.totalorder %s756_s23, 3 }
   0xd   : > { %p831_p6 = por %p158_p3, %p44_p0  ;;  %s189_s29 = sshll.u32 %s1021_s2, 4  ;;  %s190_s29 = int_to_ptr.vmem [resolvable:$true] %s189_s29 }
   0xe   : > { %s1028_s25 = scalar_select %p826_p4, 1, 0 }
   0xf   : > { %s1029_s26 = scalar_select %p831_p6, 1, 0 }
  0x10   : > { %p839_p8 = pnand %p481_p5, %p165_p7  ;;  %s178_s8 = sshll.u32 %s1020_s1, 4  ;;  %s179_s8 = int_to_ptr.vmem [resolvable:$true] %s178_s8 }
  0x11   : > { %s200_s12 = sshll.u32 %s1022_s3, 4  ;;  %s607_s13 = scalar_lea.vmem %s190_s29, 16  ;;  %s858_s12 = int_to_ptr.vmem [resolvable:$true] %s200_s12 }
  0x12   : > { %s1030_s30 = scalar_select %p839_p8, 1, 0 }
  0x13   : > { %p536_p10 = pneg %p839_p8  ;;  %p608_p12 = scmp.ne.s32.totalorder %s190_s29, %s607_s13 }
  0x14   : > { %p615_p5 = scmp.lt.s32.totalorder %s190_s29, %s190_s29  ;;  %p616_p7 = scmp.lt.s32.totalorder %s607_s13, %s607_s13 }
  0x15   : > { %p851_p11 = pnand %p536_p10, %p1025_p1 }
  0x16   : > { %p617_p10 = por %p616_p7, %p615_p5 }
  0x17   : > { %p609_p13 = pneg %p851_p11 }
  0x19   : > { %p610_p0 = pnand %p609_p13, %p608_p12 }
  0x1b   : > { %p611_p3 = pneg %p610_p0 }
  0x1d   : > { %p618_p9 = pnand %p617_p10, %p611_p3 }
  0x1f   : > { %621 = shalt.err (!%p618_p9)
}
  0x20   : > { %s758_s14 = smov [#allocation8]   ;;  %s622_s15 = scalar_lea.vmem %s179_s8, 32 }
  0x21   : > { %542 = dma.vmem_to_smem (!%p851_p11), %s190_s29, 16, %s758_s14, [#allocation9]  }
  0x22   : > { %p623_p1 = scmp.ne.s32.totalorder %s179_s8, %s622_s15  ;;  %p630_p4 = scmp.lt.s32.totalorder %s179_s8, %s179_s8 }
  0x23   : > { %p631_p8 = scmp.lt.s32.totalorder %s622_s15, %s622_s15 }
  0x24   : > { %p625_p2 = pnand %p623_p1, %p609_p13 }
  0x25   : > { %p632_p12 = por %p631_p8, %p630_p4 }
  0x26   : > { %p626_p6 = pneg %p625_p2 }
  0x28   : > { %p633_p0 = pnand %p632_p12, %p626_p6 }
  0x2a   : > { %636 = shalt.err (!%p633_p0)
}
  0x2b   : > { %s759_s16 = smov [#allocation7]   ;;  %s637_s17 = scalar_lea.vmem %s858_s12, 128 }
  0x2c   : > { %539 = dma.vmem_to_smem (!%p851_p11), %s179_s8, 32, %s759_s16, [#allocation6]  }
  0x2d   : > { %p638_p9 = scmp.ne.s32.totalorder %s858_s12, %s637_s17  ;;  %p645_p2 = scmp.lt.s32.totalorder %s858_s12, %s858_s12 }
  0x2e   : > { %p646_p5 = scmp.lt.s32.totalorder %s637_s17, %s637_s17 }
  0x2f   : > { %p640_p3 = pnand %p638_p9, %p609_p13 }
  0x30   : > { %p647_p4 = por %p646_p5, %p645_p2 }
  0x31   : > { %p641_p1 = pneg %p640_p3 }
  0x33   : > { %p648_p6 = pnand %p647_p4, %p641_p1 }
  0x35   : > { %651 = shalt.err (!%p648_p6)
}
  0x36   : > { %s760_s18 = smov [#allocation10]   ;;  %s883_s19 = sadd.s32 1, %s756_s23  }
  0x37   : > { %545 = dma.vmem_to_smem (!%p851_p11), %s858_s12, 128, %s760_s18, [#allocation9]  }
  0x38   : > { %s28_s24 = ssub.s32 %s756_s23, %s883_s19  ;;  %s31_s27 = sadd.s32 1, %s752_s22 }
  0x39   : > { %p29_p8 = scmp.eq.s32.totalorder %s28_s24, 0  ;;  %p38_p13 = scmp.ne.s32.totalorder %s752_s22, %s748_s21 }
  0x3a   : > { %p39_p7 = scmp.eq.s32.totalorder %s756_s23, 0  ;;  %p557_p10 = scmp.lt.s32.totalorder %s756_s23, 2 }
  0x3b   : > { %s893_s28 = scalar_select %p29_p8, %s752_s22, %s31_s27  }
  0x3c   : > { %p40_p12 = por %p39_p7, %p38_p13  ;;  %p1032_p0 = scmp.eq.s32.totalorder %s817_s4, 1 }
  0x3d   : > { %s214_s6 = sand.u32 1, %s752_s22   ;;  %s518_s7 = sshll.u32 %s756_s23, 8 }
  0x3e   : > { %p897_p9 = por %p1032_p0, %p38_p13  ;;  %s486_s8 = sshll.u32 %s214_s6, 4 }
  0x3f   : > { %s906_s11 = scalar_lea.hbm %s1019_s0, %s518_s7  ;;  %s218_s12 = scalar_lea.vmem [#allocation3], %s486_s8 }
  0x40   : > { %s226_s13 = sshll.u32 %s218_s12, 4  ;;  %p908_p11 = pnand %p557_p10, %p40_p12  ;;  %s912_s13 = int_to_ptr.vmem [resolvable:$true] %s226_s13 }
  0x41   : > { %s215_s15 = scalar_lea.sflag [#allocation4], %s214_s6  ;;  %s652_s16 = scalar_lea.hbm %s906_s11, 256 }
  0x42   : > { %p653_p3 = scmp.ne.s32.totalorder %s906_s11, %s652_s16  ;;  %p654_p1 = pneg %p908_p11 }
  0x43   : > { %s657_s24 = scalar_lea.hbm %s1019_s0, 512  ;;  %p658_p4 = scmp.lt.u32.totalorder %s906_s11, %s1019_s0 }
  0x44   : > { %p655_p2 = pnand %p654_p1, %p653_p3  ;;  %p659_p6 = scmp.lt.u32.totalorder %s657_s24, %s652_s16 }
  0x45   : > { %p661_p13 = scmp.lt.u32.totalorder %s652_s16, %s906_s11 }
  0x46   : > { %p656_p5 = pneg %p655_p2  ;;  %p660_p8 = por %p659_p6, %p658_p4 }
  0x48   : > { %p662_p7 = por %p661_p13, %p660_p8 }
  0x4a   : > { %p663_p10 = pnand %p662_p7, %p656_p5 }
  0x4c   : > { %666 = shalt.err (!%p663_p10)
}
  0x4d   : > { %s667_s6 = scalar_lea.vmem %s912_s13, 256  ;;  %s761_s8 = smov [#allocation3]  }
  0x4e   : > { %p668_p12 = scmp.ne.s32.totalorder %s912_s13, %s667_s6  ;;  %s672_s9 = sshll.u32 %s761_s8, 4  ;;  %s673_s9 = int_to_ptr.vmem [resolvable:$false] %s672_s9 }
  0x4f   : > { %s674_s10 = scalar_lea.vmem %s673_s9, 512  ;;  %p675_p2 = scmp.lt.s32.totalorder %s912_s13, %s673_s9 }
  0x50   : > { %p670_p0 = pnand %p668_p12, %p654_p1  ;;  %p676_p4 = scmp.lt.s32.totalorder %s674_s10, %s667_s6 }
  0x52   : > { %p671_p3 = pneg %p670_p0  ;;  %p677_p6 = por %p676_p4, %p675_p2 }
  0x54   : > { %p678_p8 = pnand %p677_p6, %p671_p3 }
  0x56   : > { %681 = shalt.err (!%p678_p8)
}
  0x57   : > { %549 = dma.hbm_to_vmem [thread:$0]  (!%p908_p11), %s906_s11, 256, %s912_s13, %s215_s15  }
  0x58   : > { %p1035_p5 = scmp.ne.s32.totalorder %s1030_s30, 0 }
  0x59   : > { %s942_s12 = sand.u32 (!%p1035_p5), 1, %s748_s21   ;;  %p1036_p1 = scmp.ne.s32.totalorder (!%p1035_p5), %s1028_s25, 0 }
  0x5a   : > { %235 = sbr.rel (%p1035_p5) target bundleno = 159 (0x9f), region = 40  ;;  %s490_s16 = sshll.u32 (!%p1035_p5), %s942_s12, 4 }
  0x5b   : > { %s238_s17 = scalar_lea.sflag (!%p1035_p5), [#allocation4], %s942_s12  ;;  %s241_s18 = scalar_lea.vmem (!%p1035_p5), [#allocation3], %s490_s16 }
  0x61   : > { %727 = dma.done.wait (%p1036_p1), %s238_s17, 256  }
  0x62   : > { %729 = vsyncadd (%p1036_p1), %s238_s17, 4294967040  ;;  %p1037_p13 = scmp.eq.s32.totalorder %s817_s4, 0 }
  0x64   : > { %731 = dma.done.wait (%p1037_p13), [#allocation6], 32   ;;  %p1038_p11 = pmov %p1037_p13 }
  0x66   : > { %733 = vsyncadd (%p1038_p11), [#allocation6], 4294967264  ;;  %p1039_p7 = pmov %p1038_p11 }
  0x68   : > { %735 = dma.done.wait (%p1039_p7), [#allocation9], 144   ;;  %p1040_p10 = pmov %p1039_p7 }
  0x6a   : > { %737 = vsyncadd (%p1040_p10), [#allocation9], 4294967152 }
  0x6b   : > { %258 = sfence }
  0x6c   : > { %s288_s30 = sld [smem:[#allocation7]]  ;;  %s497_s14 = sld [smem:[#allocation7 + $0x1]]  ;;  %v283_v0 = vld [vmem:[%s241_s18] ss:$2 sm:$0xff]  ;;  %v495_v1 = vld [vmem:[%s241_s18 + $0x1] ss:$2 sm:$0xff] }
  0x6d   : > { %s496_s11 = sld [smem:[#allocation7 + $0x80]]  ;;  %s498_s15 = sld [smem:[#allocation7 + $0x81]] }
  0x6e   : > { %s295_s13 = sld [smem:[#allocation8]]  ;;  %s958_s25 = sld [smem:[#allocation8 + $0x1]] }
  0x6f   : > { %s501_s24 = sld [smem:[#allocation7 + $0x2]]  ;;  %s505_s6 = sld [smem:[#allocation7 + $0x3]] }
  0x70   : > { %s502_s27 = sld [smem:[#allocation7 + $0x82]]  ;;  %s506_s8 = sld [smem:[#allocation7 + $0x83]] }
  0x71   : > { %s960_s7 = sld [smem:[#allocation8 + $0x2]]  ;;  %s962_s9 = sld [smem:[#allocation8 + $0x3]] }
  0x72   : > { %v289_v2 = vstv %s288_s30  ;;  %v304_v7 = vstv %s497_s14  ;;  %s509_s10 = sld [smem:[#allocation7 + $0x4]]  ;;  %s299_s18 = sld [smem:[#allocation10]] }
  0x73   : > { %v292_v3 = vstv %s496_s11  ;;  %v290_v4 = vmul.f32 %v289_v2, %v283_v0  ;;  %v307_v8 = vstv %s498_s15  ;;  %s510_s16 = sld [smem:[#allocation7 + $0x84]]  ;;  %v305_v10 = vmul.f32 %v304_v7, %v283_v0  ;;  %s286_s30 = sld [smem:[#allocation2]] }
  0x74   : > { %v293_v5 = vmul.f32 %v495_v1, %v292_v3  ;;  %v296_v6 = vstv %s295_s13  ;;  %v308_v11 = vmul.f32 %v495_v1, %v307_v8  ;;  %s964_s17 = sld [smem:[#allocation8 + $0x4]]  ;;  %v311_v12 = vstv %s958_s25  ;;  %s500_s11 = sld [smem:[#allocation10 + $0x80]] }
  0x75   : > { %v319_v13 = vstv %s501_s24  ;;  %v334_v20 = vstv %s505_s6  ;;  %s504_s13 = sld [smem:[#allocation10 + $0x100]]  ;;  %s494_s25 = sshll.u32 %s942_s12, 3 }
  0x76   : > { %v294_v9 = vadd.f32 %v293_v5, %v290_v4  ;;  %v322_v14 = vstv %s502_s27  ;;  %v309_v16 = vadd.f32 %v308_v11, %v305_v10  ;;  %v320_v17 = vmul.f32 %v319_v13, %v283_v0  ;;  %s508_s14 = sld [smem:[#allocation10 + $0x180]]  ;;  %s280_s24 = scalar_lea.vmem [#allocation11], %s494_s25 }
  0x77   : > { %v323_v18 = vmul.f32 %v495_v1, %v322_v14  ;;  %v326_v19 = vstv %s960_s7  ;;  %v337_v21 = vstv %s506_s8  ;;  %v335_v24 = vmul.f32 %v334_v20, %v283_v0  ;;  %s512_s15 = sld [smem:[#allocation10 + $0x200]]  ;;  %s379_s27 = sshll.u32 %s280_s24, 4  ;;  %s972_s27 = int_to_ptr.vmem [resolvable:$true] %s379_s27 }
  0x78   : > { %v297_v15 = vadd.f32 %v296_v6, %v294_v9  ;;  %v312_v22 = vadd.f32 %v311_v12, %v309_v16  ;;  %v338_v25 = vmul.f32 %v495_v1, %v337_v21  ;;  %v341_v26 = vstv %s962_s9  ;;  %s519_s7 = sshll.u32 %s817_s4, 7  ;;  %s762_s4 = smov [#allocation11]  }
  0x79   : > { %v324_v23 = vadd.f32 %v323_v18, %v320_v17  ;;  %v349_v27 = vstv %s509_s10  ;;  %v352_v30 = vstv %s510_s16  ;;  %v300_v37 = vstv %s299_s18  ;;  %s977_s9 = scalar_lea.hbm %s1024_s5, %s519_s7  ;;  %s365_s10 = scalar_lea.sflag [#allocation5], %s942_s12 }
  0x7a   : > { %597 = vtanh.f32 %v297_v15  ;;  %v350_v29 = vmul.f32 %v349_v27, %v283_v0  ;;  %v339_v31 = vadd.f32 %v338_v25, %v335_v24  ;;  %v353_v32 = vmul.f32 %v495_v1, %v352_v30  ;;  %s682_s16 = scalar_lea.vmem %s972_s27, 128 }
  0x7b   : > { %599 = vtanh.f32 %v312_v22  ;;  %v327_v28 = vadd.f32 %v326_v19, %v324_v23  ;;  %v356_v33 = vstv %s964_s17  ;;  %v287_v39 = vstv %s286_s30  ;;  %p683_p12 = scmp.ne.s32.totalorder %s972_s27, %s682_s16  ;;  %s686_s17 = sshll.u32 %s762_s4, 4  ;;  %s687_s17 = int_to_ptr.vmem [resolvable:$false] %s686_s17 }
  0x7c   : > { %v342_v34 = vadd.f32 %v341_v26, %v339_v31  ;;  %v354_v35 = vadd.f32 %v353_v32, %v350_v29  ;;  %v315_v40 = vstv %s500_s11  ;;  %v330_v43 = vstv %s504_s13  ;;  %s688_s18 = scalar_lea.vmem %s687_s17, 256  ;;  %p689_p2 = scmp.lt.s32.totalorder %s972_s27, %s687_s17 }
  0x7d   : > { %601 = vtanh.f32 %v327_v28  ;;  %v345_v49 = vstv %s508_s14  ;;  %v360_v52 = vstv %s512_s15  ;;  %p684_p0 = pnand %p683_p12, %p897_p9  ;;  %p690_p4 = scmp.lt.s32.totalorder %s688_s18, %s682_s16 }
  0x7e   : > { %603 = vtanh.f32 %v342_v34  ;;  %v357_v36 = vadd.f32 %v356_v33, %v354_v35 }
  0x7f   : > { %p685_p3 = pneg %p684_p0  ;;  %p691_p6 = por %p690_p4, %p689_p2 }
  0x80   : > { %605 = vtanh.f32 %v357_v36 }
  0x81   : > { %p692_p8 = pnand %p691_p6, %p685_p3 }
  0x84   : > { %v598_v38 = vpop.eup %597 }
  0x85   : > { %v301_v41 = vmul.f32 %v598_v38, %v300_v37  ;;  %v600_v42 = vpop.eup %599 }
  0x86   : > { %v316_v45 = vmul.f32 %v600_v42, %v315_v40 }
  0x87   : > { %v302_v44 = vadd.f32 %v301_v41, %v287_v39  ;;  %v602_v46 = vpop.eup %601 }
  0x88   : > { %v331_v48 = vmul.f32 %v602_v46, %v330_v43  ;;  %v604_v50 = vpop.eup %603 }
  0x89   : > { %v317_v47 = vadd.f32 %v316_v45, %v302_v44  ;;  %v346_v53 = vmul.f32 %v604_v50, %v345_v49 }
  0x8a   : > { %v606_v54 = vpop.eup %605 }
  0x8b   : > { %v332_v51 = vadd.f32 %v331_v48, %v317_v47  ;;  %v361_v56 = vmul.f32 %v606_v54, %v360_v52 }
  0x8d   : > { %v347_v55 = vadd.f32 %v346_v53, %v332_v51 }
  0x8f   : > { %v362_v57 = vadd.f32 %v361_v56, %v347_v55 }
  0x91   : > { %363 = vst [vmem:[%s280_s24] sm:$0xff] %v362_v57 }
  0x92   : > { %695 = shalt.err (!%p692_p8)
}
  0x93   : > { %s696_s12 = scalar_lea.hbm %s977_s9, 128  ;;  %s700_s13 = scalar_lea.hbm %s1024_s5, 256 }
  0x94   : > { %p697_p5 = scmp.ne.s32.totalorder %s977_s9, %s696_s12  ;;  %p701_p11 = scmp.lt.u32.totalorder %s977_s9, %s1024_s5 }
  0x95   : > { %p702_p7 = scmp.lt.u32.totalorder %s700_s13, %s696_s12  ;;  %p704_p12 = scmp.lt.u32.totalorder %s696_s12, %s977_s9 }
  0x96   : > { %p698_p1 = pnand %p697_p5, %p897_p9 }
  0x97   : > { %p703_p10 = por %p702_p7, %p701_p11 }
  0x98   : > { %p699_p13 = pneg %p698_p1 }
  0x99   : > { %p705_p0 = por %p704_p12, %p703_p10 }
  0x9b   : > { %p706_p3 = pnand %p705_p0, %p699_p13 }
  0x9d   : > { %709 = shalt.err (!%p706_p3)
}
  0x9e   : > { %534 = dma.vmem_to_hbm [thread:$0]  (%p897_p9), %s972_s27, 128, %s977_s9, %s365_s10  }
  0x9f PF: > { %s391_s25 = sand.u32 1, %s744_s20   ;;  %p1041_p2 = scmp.ne.s32.totalorder %s1029_s26, 0 }
  0xa0   : > { %p1042_p4 = scmp.ge.s32.totalorder %s756_s23, 2  ;;  %s392_s24 = scalar_lea.sflag [#allocation5], %s391_s25 }
  0xa2   : > { %p551_p6 = pnand %p1042_p4, %p1041_p2 }
  0xa4   : > { %739 = dma.done.wait (!%p551_p6), %s392_s24, 128  }
  0xa5   : > { %741 = vsyncadd (!%p551_p6), %s392_s24, 4294967168  ;;  %p21_p8 = scmp.ge.s32.totalorder %s883_s19, 4   ;;  %s1043_s20 = smov %s748_s21 }
  0xa6   : > { %s1044_s21 = smov %s752_s22  ;;  %s1045_s22 = smov %s893_s28 }
  0xa7   : > { %s1046_s23 = smov %s883_s19  ;;  %23 = sbr.rel (!%p21_p8) target bundleno = 9 (0x9), region = 99 }
  0xae   :  { %397 = vsyncpa [#allocation4], 1 }
  0xaf   :  { %399 = vsyncpa [#allocation4 + $0x1], 1 }
  0xb0   :  { %400 = vsyncpa [#allocation5], 1 }
  0xb1   :  { %402 = vsyncpa [#allocation5 + $0x1], 1 }
  0xb2   :  { %403 = vsyncpa [#allocation6], 1 }
  0xb3   :  { %405 = vsyncpa [#allocation6 + $0x1], 1 }
  0xb4   :  { %406 = vsyncpa [#allocation9], 1 }

</bundles_post_ra>
